<compile_context>
chip_gen: v7x
topology: tpu7x:2x2x1
jax: 0.10.0
libtpu: 0.0.40
codegen_flags: <defaults>
</compile_context>

<pallas_src>
import functools

import jax
import jax.numpy as jnp
from jax.experimental import pallas as pl
from jax.experimental.pallas import tpu as pltpu


def _pg_loss_kernel(rewards_ref, action_ref, pro_ref, out_ref, acc_ref, *,
                    n_total, tile_n, tiles_per_core):
    """One grid step over a lane-dense (C, TILE_N) slab of (class, batch) `pro`.

    rewards_ref: (1, T) float    action_ref: (1, T) int    pro_ref: (C, T) float
    out_ref:     (1, 1, 1) f32   (one partial sum per core, resident across steps)
    acc_ref:     (1, T) f32 VMEM scratch (per-lane partial sums)
    """
    core = pl.program_id(0)
    step = pl.program_id(1)

    @pl.when(step == 0)
    def _init():
        acc_ref[...] = jnp.zeros_like(acc_ref)

    pro = pro_ref[...].astype(jnp.float32)        # (C, T) -- bf16 input OK
    act = action_ref[...].astype(jnp.int32)       # (1, T) -- int8 input OK
    rew = rewards_ref[...].astype(jnp.float32)    # (1, T)
    c, t = pro.shape

    # Pick the selected-class probability along the tiny class (sublane) axis
    # FIRST, then log only the T picked values (4x less EUP work, no 0*log(0)).
    cls = jax.lax.broadcasted_iota(jnp.int32, (c, t), 0)
    picked = jnp.sum(jnp.where(cls == act, pro, 0.0), axis=0, keepdims=True)  # (1, T)

    # In-kernel ragged-tail mask (replaces the old jnp.pad HBM pass): any lane
    # whose global column index is >= the true batch size contributes exactly 0
    # (this also neutralizes overhanging / clamped-duplicate tiles on core 1).
    col0 = (core * tiles_per_core + step) * tile_n
    col = col0 + jax.lax.broadcasted_iota(jnp.int32, (1, t), 1)
    contrib = jnp.where(col < n_total, rew * jnp.log(picked), 0.0)

    # VPU-only hot loop: elementwise accumulate per-lane partial sums.
    acc_ref[...] += contrib

    @pl.when(step == tiles_per_core - 1)
    def _finalize():
        # One cross-lane reduce per core; sign and divide-by-N are done in the
        # wrapper on the (num_cores, 1, 1) partials.
        out_ref[...] = jnp.reshape(jnp.sum(acc_ref[...]), (1, 1, 1))


def policy_gradient_loss(rewards, action, pro, *, pro_is_cn=False, tile_n=None):
    """REINFORCE NLL loss:  -mean_i rewards[i] * log(pro[i, action[i]]).

    rewards: (N,) float; action: (N,) or (N,1) int in [0, C).
    pro:
      * (N, C) probabilities if pro_is_cn=False (torch-compatible layout), or
      * (C, N) probabilities if pro_is_cn=True  (lane-dense producer layout --
        preferred: avoids a wrapper transpose that costs more HBM traffic than
        the kernel itself on large N).
    Returns a scalar f32.
    """
    if pro_is_cn:
        pro_cn = pro                                    # (C, N)
    else:
        # NOTE: this transpose is a separate un-hidden XLA pass; producers
        # should emit (C, N) directly (pro_is_cn=True) on the hot path.
        pro_cn = pro.T                                  # (C, N)
    c, n = pro_cn.shape

    rew2d = rewards.reshape(1, n)                       # (1, N) -- no dtype cast here
    act2d = action.reshape(1, n)                        # (1, N)

    # --- tile sizing / VMEM budget -----------------------------------------
    # Lane-dense layout (batch on lanes).  Per grid step, in VMEM:
    #   rew (1,T) padded to 8 sublanes: 32*T B,  act (1,T): 32*T B,
    #   pro (C<=8,T): 32*T B   =>  ~96*T per buffer set, x2 double-buffered,
    #   + 32*T acc scratch  =>  ~224*T bytes.
    # T = 128K lanes -> ~28 MiB: fits v7x's 64 MiB/TC and v5e/v6e once the
    # scoped limit is raised, and per-step DMA (>~1 us) amortizes the ~0.35 us
    # grid-step overhead.
    TILE_MAX = 128 * 1024
    if tile_n is None:
        tile_n = min(TILE_MAX, pl.cdiv(n, 128) * 128)
    tile_n = max(128, (int(tile_n) // 128) * 128)       # lane-aligned
    num_tiles = pl.cdiv(n, tile_n)

    # Split the batch across TensorCores (v7x has 2 TCs; on single-TC chips the
    # leading "parallel" axis is just a serial loop with negligible overhead).
    num_cores = 2
    tiles_per_core = pl.cdiv(num_tiles, num_cores)

    vmem_limit = int(min(max(224 * tile_n + (4 << 20), 16 << 20), 56 << 20))

    def _col_map(core, step):
        # Clamp so the DMA offset always points at a real block; the kernel's
        # global-column mask zeroes any duplicated / out-of-range columns.
        return (0, jnp.minimum(core * tiles_per_core + step, num_tiles - 1))

    kernel = functools.partial(
        _pg_loss_kernel, n_total=n, tile_n=tile_n, tiles_per_core=tiles_per_core)

    partials = pl.pallas_call(
        kernel,
        out_shape=jax.ShapeDtypeStruct((num_cores, 1, 1), jnp.float32),
        grid=(num_cores, tiles_per_core),
        in_specs=[
            pl.BlockSpec((1, tile_n), _col_map),        # rewards (1, N)
            pl.BlockSpec((1, tile_n), _col_map),        # action  (1, N)
            pl.BlockSpec((c, tile_n), _col_map),        # pro     (C, N)
        ],
        # Each core owns its own (1,1,1) partial, resident across the
        # "arbitrary" reduction axis.
        out_specs=pl.BlockSpec((1, 1, 1), lambda core, step: (core, 0, 0)),
        scratch_shapes=[pltpu.VMEM((1, tile_n), jnp.float32)],
        compiler_params=pltpu.CompilerParams(
            dimension_semantics=("parallel", "arbitrary"),
            vmem_limit_bytes=vmem_limit,
        ),
    )(rew2d, act2d, pro_cn)

    # Divide by the TRUE batch size (never the padded/tile-rounded one).
    return -jnp.sum(partials) / jnp.float32(n)


if __name__ == "__main__":
    key = jax.random.PRNGKey(0)
    k1, k2, k3, k4, k5, k6 = jax.random.split(key, 6)

    # --- Test 1: torch-compatible (N, 4) layout, tiny batch ------------------
    N, C = 8, 4
    pro = jax.nn.softmax(jax.random.normal(k1, (N, C), dtype=jnp.float32), axis=-1)
    action = jax.random.randint(k2, (N,), 0, C, dtype=jnp.int32)
    rewards = jax.random.normal(k3, (N,), dtype=jnp.float32)

    loss = policy_gradient_loss(rewards, action, pro)
    jax.block_until_ready(loss)
    ref = -jnp.mean(rewards * jnp.log(pro[jnp.arange(N), action]))
    assert jnp.allclose(loss, ref, atol=1e-5, rtol=1e-5), (loss, ref)

    # --- Test 2: producer-side (C, N) layout, multi-step grid + ragged tail --
    # (no wrapper transpose, exercises per-core split, clamped overhanging tile
    #  on core 1, and the in-kernel ragged-tail mask)
    N2 = 300
    pro_cn = jax.nn.softmax(
        jax.random.normal(k4, (C, N2), dtype=jnp.float32), axis=0)   # (C, N) direct
    action2 = jax.random.randint(k5, (N2,), 0, C, dtype=jnp.int32)
    rewards2 = jax.random.normal(k6, (N2,), dtype=jnp.float32)

    loss2 = policy_gradient_loss(rewards2, action2, pro_cn, pro_is_cn=True, tile_n=128)
    jax.block_until_ready(loss2)
    pro2 = pro_cn.T
    ref2 = -jnp.mean(rewards2 * jnp.log(pro2[jnp.arange(N2), action2]))
    assert jnp.allclose(loss2, ref2, atol=1e-5, rtol=1e-5), (loss2, ref2)

    print("KERNEL_OK")
</pallas_src>

<mosaic_0001>
module attributes {stable_mosaic.version = 11 : i64} {
  func.func @_pg_loss_kernel(%arg0: i32, %arg1: i32, %arg2: memref<1x128xf32, #tpu.memory_space<vmem>>, %arg3: memref<1x128xi32, #tpu.memory_space<vmem>>, %arg4: memref<4x128xf32, #tpu.memory_space<vmem>>, %arg5: memref<1x1x1xf32, #tpu.memory_space<vmem>>, %arg6: memref<1x128xf32, #tpu.memory_space<vmem>>) attributes {dimension_semantics = [#tpu.dimension_semantics<parallel>, #tpu.dimension_semantics<arbitrary>], iteration_bounds = array<i64: 2, 1>, scalar_prefetch = 0 : i64, scratch_operands = 1 : i64, tpu.core_type = #tpu.core_type<tc>, window_params = [{transform_indices = @transform_0, window_bounds = array<i64: 1, 128>}, {transform_indices = @transform_1, window_bounds = array<i64: 1, 128>}, {transform_indices = @transform_2, window_bounds = array<i64: 4, 128>}, {transform_indices = @transform_3, window_bounds = array<i64: 1, 1, 1>}]} {
    %c0_i32 = arith.constant 0 : i32
    %0 = arith.cmpi eq, %arg1, %c0_i32 : i32
    %1 = arith.extui %0 : i1 to i32
    %c0_i32_0 = arith.constant 0 : i32
    %2 = arith.cmpi ne, %1, %c0_i32_0 : i32
    scf.if %2 {
      %cst_14 = arith.constant 0.000000e+00 : f32
      %31 = vector.broadcast %cst_14 : f32 to vector<1x128xf32>
      %c0_15 = arith.constant 0 : index
      %c0_16 = arith.constant 0 : index
      %32 = vector.load %arg6[%c0_15, %c0_16] : memref<1x128xf32, #tpu.memory_space<vmem>>, vector<1x128xf32>
      tpu.vector_store %arg6[%c0_15, %c0_16], %31 {strides = array<i32>} : memref<1x128xf32, #tpu.memory_space<vmem>>, vector<1x128xf32>,
    } else {
    }
    %c0 = arith.constant 0 : index
    %c0_1 = arith.constant 0 : index
    %3 = vector.load %arg4[%c0, %c0_1] : memref<4x128xf32, #tpu.memory_space<vmem>>, vector<4x128xf32>
    %c0_2 = arith.constant 0 : index
    %c0_3 = arith.constant 0 : index
    %4 = vector.load %arg3[%c0_2, %c0_3] : memref<1x128xi32, #tpu.memory_space<vmem>>, vector<1x128xi32>
    %c0_4 = arith.constant 0 : index
    %c0_5 = arith.constant 0 : index
    %5 = vector.load %arg2[%c0_4, %c0_5] : memref<1x128xf32, #tpu.memory_space<vmem>>, vector<1x128xf32>
    %6 = tpu.iota {dimensions = array<i32: 0>} : vector<4x128xi32>
    %7 = vector.broadcast %4 : vector<1x128xi32> to vector<4x128xi32>
    %8 = arith.cmpi eq, %6, %7 : vector<4x128xi32>
    %cst = arith.constant 0.000000e+00 : f32
    %9 = vector.broadcast %cst : f32 to vector<4x128xf32>
    %10 = arith.select %8, %3, %9 : vector<4x128xi1>, vector<4x128xf32>
    %cst_6 = arith.constant dense<0.000000e+00> : vector<128xf32>
    %11 = vector.multi_reduction <add>, %10, %cst_6 [0] : vector<4x128xf32> to vector<128xf32>
    %12 = vector.shape_cast %11 : vector<128xf32> to vector<1x128xf32>
    %c1_i32 = arith.constant 1 : i32
    %13 = arith.muli %arg0, %c1_i32 : i32
    %14 = arith.addi %13, %arg1 : i32
    %c128_i32 = arith.constant 128 : i32
    %15 = arith.muli %14, %c128_i32 : i32
    %16 = tpu.iota {dimensions = array<i32: 1>} : vector<1x128xi32>
    %17 = vector.broadcast %15 : i32 to vector<1x128xi32>
    %18 = arith.addi %17, %16 : vector<1x128xi32>
    %c8_i32 = arith.constant 8 : i32
    %19 = vector.broadcast %c8_i32 : i32 to vector<1x128xi32>
    %20 = arith.cmpi slt, %18, %19 : vector<1x128xi32>
    %21 = math.log %12 : vector<1x128xf32>
    %22 = arith.mulf %5, %21 : vector<1x128xf32>
    %cst_7 = arith.constant 0.000000e+00 : f32
    %23 = vector.broadcast %cst_7 : f32 to vector<1x128xf32>
    %24 = arith.select %20, %22, %23 : vector<1x128xi1>, vector<1x128xf32>
    %c0_8 = arith.constant 0 : index
    %c0_9 = arith.constant 0 : index
    %25 = vector.load %arg6[%c0_8, %c0_9] : memref<1x128xf32, #tpu.memory_space<vmem>>, vector<1x128xf32>
    %26 = arith.addf %25, %24 : vector<1x128xf32>
    %c0_10 = arith.constant 0 : index
    %c0_11 = arith.constant 0 : index
    %27 = vector.load %arg6[%c0_10, %c0_11] : memref<1x128xf32, #tpu.memory_space<vmem>>, vector<1x128xf32>
    tpu.vector_store %arg6[%c0_10, %c0_11], %26 {strides = array<i32>} : memref<1x128xf32, #tpu.memory_space<vmem>>, vector<1x128xf32>,
    %c0_i32_12 = arith.constant 0 : i32
    %28 = arith.cmpi eq, %arg1, %c0_i32_12 : i32
    %29 = arith.extui %28 : i1 to i32
    %c0_i32_13 = arith.constant 0 : i32
    %30 = arith.cmpi ne, %29, %c0_i32_13 : i32
    scf.if %30 {
      %c0_14 = arith.constant 0 : index
      %c0_15 = arith.constant 0 : index
      %31 = vector.load %arg6[%c0_14, %c0_15] : memref<1x128xf32, #tpu.memory_space<vmem>>, vector<1x128xf32>
      %32 = vector.shape_cast %31 : vector<1x128xf32> to vector<1x1x128xf32>
      %cst_16 = arith.constant dense<0.000000e+00> : vector<1xf32>
      %33 = vector.multi_reduction <add>, %32, %cst_16 [1, 2] : vector<1x1x128xf32> to vector<1xf32>
      %34 = vector.shape_cast %33 : vector<1xf32> to vector<1x1x1xf32>
      %35 = vector.extract %34[0, 0, 0] : f32 from vector<1x1x1xf32>
      %36 = vector.broadcast %35 : f32 to vector<1x1x1xf32>
      %c0_17 = arith.constant 0 : index
      %c0_18 = arith.constant 0 : index
      %c0_19 = arith.constant 0 : index
      %37 = vector.load %arg5[%c0_17, %c0_18, %c0_19] : memref<1x1x1xf32, #tpu.memory_space<vmem>>, vector<1x1x1xf32>
      tpu.vector_store %arg5[%c0_17, %c0_18, %c0_19], %36 {strides = array<i32>} : memref<1x1x1xf32, #tpu.memory_space<vmem>>, vector<1x1x1xf32>,
    } else {
    }
    return
  }
  func.func @transform_0(%arg0: i32, %arg1: i32) -> (i32, i32) {
    %c1_i32 = arith.constant 1 : i32
    %0 = arith.muli %arg0, %c1_i32 : i32
    %1 = arith.addi %0, %arg1 : i32
    %c0_i32 = arith.constant 0 : i32
    %2 = arith.minsi %1, %c0_i32 : i32
    %c0_i32_0 = arith.constant 0 : i32
    %c0_i32_1 = arith.constant 0 : i32
    return %c0_i32_0, %2 : i32, i32
  }
  func.func @transform_1(%arg0: i32, %arg1: i32) -> (i32, i32) {
    %c1_i32 = arith.constant 1 : i32
    %0 = arith.muli %arg0, %c1_i32 : i32
    %1 = arith.addi %0, %arg1 : i32
    %c0_i32 = arith.constant 0 : i32
    %2 = arith.minsi %1, %c0_i32 : i32
    %c0_i32_0 = arith.constant 0 : i32
    %c0_i32_1 = arith.constant 0 : i32
    return %c0_i32_0, %2 : i32, i32
  }
  func.func @transform_2(%arg0: i32, %arg1: i32) -> (i32, i32) {
    %c1_i32 = arith.constant 1 : i32
    %0 = arith.muli %arg0, %c1_i32 : i32
    %1 = arith.addi %0, %arg1 : i32
    %c0_i32 = arith.constant 0 : i32
    %2 = arith.minsi %1, %c0_i32 : i32
    %c0_i32_0 = arith.constant 0 : i32
    %c0_i32_1 = arith.constant 0 : i32
    return %c0_i32_0, %2 : i32, i32
  }
  func.func @transform_3(%arg0: i32, %arg1: i32) -> (i32, i32, i32) {
    %c0_i32 = arith.constant 0 : i32
    %c0_i32_0 = arith.constant 0 : i32
    %c0_i32_1 = arith.constant 0 : i32
    return %arg0, %c0_i32, %c0_i32_0 : i32, i32, i32
  }
}

</mosaic_0001>

<bundles_post_ra>
// kernel: tpu_custom_call.1
= control target key start
LH: loop header
LB: loop body
LE: loop exit
PB: predicated region body
PF: predicated region fallthrough
CT: control target
= control target key end

     0   :  { %8 = vsyncpa [#allocation4], 0  ;;  %s694_s0 = inlined_call_operand.hbm [shape: f32[1,8], index: 0, kind: input, shape index: {}]   ;;  %s695_s1 = inlined_call_operand.vmem [shape: s32[1,8], index: 1, kind: input, shape index: {}]   ;;  %s696_s2 = inlined_call_operand.vmem [shape: f32[4,8], index: 2, kind: input, shape index: {}]   ;;  %s697_s3 = inlined_call_operand.vmem [shape: f32[2,1,1], index: 3, kind: output, shape index: {}]  }
   0x1   :  { %10 = vsyncpa [#allocation4 + $0x1], 0  ;;  %s597_s12 = smov 0   ;;  %s599_s13 = smov 0  }
   0x2   :  { %s601_s14 = smov 0   ;;  %s603_s15 = smov 0  }
   0x3   :  { %s605_s16 = smov 0  }
   0x4 LB: > { %s419_s17 = sadd.s32 4294967295, %s573_s16   ;;  %s28_s18 = sadd.s32 1, %s569_s15  ;;  %s573_s16 = sphi %s605_s16, %s16_s16   ;;  %s569_s15 = sphi %s603_s15, %s708_s15   ;;  %s565_s14 = sphi %s601_s14, %s707_s14   ;;  %s561_s13 = sphi %s599_s13, %s684_s13   ;;  %s557_s12 = sphi %s597_s12, %s706_s12  }
   0x5   : > { %p30_p0 = scmp.ge.s32.totalorder %s28_s18, 2  ;;  %p554_p1 = scmp.ne.s32.totalorder %s561_s13, 0 }
   0x6   : > { %p49_p2 = scmp.eq.s32.totalorder %s573_s16, 0  ;;  %p54_p3 = scmp.ne.s32.totalorder %s561_s13, %s557_s12 }
   0x7   : > { %s710_s18 = smov (%p30_p0, %s28_s18), 0  ;;  %p55_p4 = scmp.eq.s32.totalorder %s419_s17, 0 }
   0x8   : > { %p50_p5 = por %p554_p1, %p49_p2  ;;  %p444_p7 = scmp.lt.s32.totalorder %s573_s16, 2 }
   0x9   : > { %p627_p6 = por %p55_p4, %p54_p3  ;;  %s575_s20 = smov [#allocation3]  }
   0xa   : > { %s181_s21 = sshll.u32 %s575_s20, 4  ;;  %p632_p8 = pnand %p444_p7, %p50_p5  ;;  %s182_s21 = int_to_ptr.vmem [resolvable:$true] %s181_s21 }
   0xb   : > { %s700_s19 = scalar_select %p627_p6, 1, 0 }
   0xc   : > { %s701_s22 = scalar_select %p632_p8, 1, 0 }
   0xd   : > { %s496_s25 = scalar_lea.hbm %s694_s0, 16  ;;  %p498_p12 = pneg %p632_p8 }
   0xe   : > { %p497_p11 = scmp.ne.s32.totalorder %s694_s0, %s496_s25  ;;  %p503_p1 = scmp.lt.u32.totalorder %s496_s25, %s496_s25 }
   0xf   : > { %p505_p2 = scmp.lt.u32.totalorder %s496_s25, %s694_s0 }
  0x10   : > { %p499_p13 = pnand %p498_p12, %p497_p11 }
  0x11   : > { %p506_p3 = por %p505_p2, %p503_p1 }
  0x12   : > { %p500_p0 = pneg %p499_p13 }
  0x14   : > { %p507_p4 = pnand %p506_p3, %p500_p0 }
  0x16   : > { %510 = shalt.err (!%p507_p4)
}
  0x17   : > { %s511_s30 = scalar_lea.vmem %s182_s21, 16  ;;  %s518_s4 = scalar_lea.vmem %s182_s21, 32 }
  0x18   : > { %p512_p5 = scmp.ne.s32.totalorder %s182_s21, %s511_s30  ;;  %p519_p10 = scmp.lt.s32.totalorder %s182_s21, %s182_s21 }
  0x19   : > { %p520_p6 = scmp.lt.s32.totalorder %s518_s4, %s511_s30 }
  0x1a   : > { %p514_p7 = pnand %p512_p5, %p498_p12 }
  0x1b   : > { %p521_p8 = por %p520_p6, %p519_p10 }
  0x1c   : > { %p515_p9 = pneg %p514_p7 }
  0x1e   : > { %p522_p11 = pnand %p521_p8, %p515_p9 }
  0x20   : > { %525 = shalt.err (!%p522_p11)
}
  0x21   : > { %p702_p13 = scmp.ne.s32.totalorder %s701_s22, 0  ;;  %p703_p0 = scmp.lt.s32.totalorder %s573_s16, 3 }
  0x22   : > { %p704_p1 = scmp.ge.s32.totalorder %s573_s16, 1 }
  0x23   : > { %443 = dma.hbm_to_vmem [thread:$0]  (!%p702_p13), %s694_s0, 16, %s182_s21, [#allocation4]  }
  0x24   : > { %p212_p2 = pnand %p704_p1, %p703_p0 }
  0x25   : > { %s217_s7 = sand.u32 (!%p212_p2), 1, %s561_s13   ;;  %p705_p6 = scmp.ne.s32.totalorder (!%p212_p2), %s700_s19, 0 }
  0x26   : > { %215 = sbr.rel (%p212_p2) target bundleno = 301 (0x12d), region = 32  ;;  %s218_s8 = scalar_lea.sflag (!%p212_p2), [#allocation4], %s217_s7 }
  0x27   : > { %s659_s9 = scalar_lea.vmem (!%p212_p2), [#allocation3], %s217_s7 }
  0x2d   : > { %551 = dma.done.wait (%p705_p6), %s218_s8, 16  }
  0x2e   : > { %553 = vsyncadd (%p705_p6), %s218_s8, 4294967280  ;;  %p257_p8 = scmp.lt.s32.totalorder %s565_s14, 0  ;;  %v286_v0 = vlaneseq  ;;  %v576_v1 = vmov 0.0   ;;  %vm294_vm0 = vcmask 1043456   ;;  %s433_s23 = sshll.u32 %s565_s14, 7  ;;  %vm320_vm3 = vcmask 1040384  }
  0x2f   : > { %282 = vst [vmem:[#allocation2] sm:$0x1] %v576_v1  ;;  %v306_v14 = vstv %s433_s23  ;;  %v285_v17 = vld [vmem:[%s659_s9] sm:$0x1]  ;;  %p275_p9 = scmp.lt.s32.totalorder %s565_s14, 1  ;;  %vm332_vm4 = vcmask 0  }
  0x30   : > { %s258_s10 = scalar_select %p257_p8, %s565_s14, 0  ;;  %v287_v2 = vshrl.u32 %v286_v0, 7  ;;  %v305_v13 = vand.u32 127, %v286_v0 }
  0x31   : > { %s714_s14 = smov (!%p275_p9, %s565_s14), 1 }
  0x32   : > { %s712_s10 = smov (!%p257_p8, %s258_s10), 0  ;;  %v307_v15 = vadd.s32 %v306_v14, %v305_v13  ;;  %s277_s26 = scalar_lea.vmem %s697_s3, %s714_s14 }
  0x33   : > { %s261_s17 = scalar_lea.vmem %s695_s1, %s712_s10  ;;  %s431_s20 = sshll.u32 %s712_s10, 2 }
  0x34   : > { %s271_s19 = scalar_lea.vmem %s696_s2, %s431_s20  ;;  %v432_v3 = vld [vmem:[%s261_s17] ss:$0 sm:$0xff]  ;;  %vm308_vm2 = vcmp.lt.s32.totalorder %v307_v15, 8 }
  0x35   : > { %v283_v4 = vld [vmem:[%s271_s19] sm:$0xf]  ;;  %vm292_vm1 = vcmp.eq.s32.totalorder %v287_v2, %v432_v3 }
  0x36   : > { %v293_v5 = vsel %vm292_vm1, %v283_v4, 0.0  ;;  %v313_v20 = vld [vmem:[#allocation2] sm:$0x1] }
  0x37   : > { %v295_v6 = vsel %vm294_vm0, %v293_v5, 0.0 }
  0x38   : > { %v296_v7 = vrot.slane %v295_v6, 4 }
  0x3a   : > { %v297_v8 = vadd.f32 %v296_v7, %v295_v6 }
  0x3c   : > { %v298_v9 = vrot.slane %v297_v8, 2 }
  0x3e   : > { %v299_v10 = vadd.f32 %v298_v9, %v297_v8 }
  0x40   : > { %v300_v11 = vrot.slane %v299_v10, 1 }
  0x42   : > { %v301_v12 = vadd.f32 %v300_v11, %v299_v10 }
  0x44   : > { %494 = vlog2.f32 %v301_v12 }
  0x4e   : > { %v495_v16 = vpop.eup %494 }
  0x4f   : > { %v310_v18 = vmul.f32 0.6931472, %v495_v16 }
  0x51   : > { %v311_v19 = vmul.f32 %v310_v18, %v285_v17 }
  0x53   : > { %v312_v21 = vsel %vm308_vm2, %v311_v19, 0.0 }
  0x54   : > { %v314_v22 = vadd.f32 %v313_v20, %v312_v21 }
  0x56   : > { %315 = vst [vmem:[#allocation2] sm:$0x1] %v314_v22 }
  0x5d   : > { %v319_v23 = vld [vmem:[#allocation2] sm:$0x1] }
  0x5e   : > { %v321_v24 = vsel %vm320_vm3, %v319_v23, 0.0 }
  0x5f   : > { %322 = vadd.xlane.f32.xlu0 %v321_v24 }
  0xec   : > { %v323_v25 = vpop.xlane.xlu0 %322 }
  0xed   : > { %v324_v26 = vrot.slane %v323_v25, 4 }
  0xef   : > { %v325_v27 = vadd.f32 %v324_v26, %v323_v25 }
  0xf1   : > { %v326_v28 = vrot.slane %v325_v27, 2 }
  0xf3   : > { %v327_v29 = vadd.f32 %v326_v28, %v325_v27 }
  0xf5   : > { %v328_v30 = vrot.slane %v327_v29, 1 }
  0xf7   : > { %v329_v31 = vadd.f32 %v328_v30, %v327_v29 }
  0xf9   : > { %436 = vpush %v329_v31 }
 0x12a   : > { %s437_s27 = spop %436 }
 0x12b   : > { %v331_v32 = vstv %s437_s27 }
 0x12c   : > { %333 = vst.msk [vmem:[%s277_s26] sm:$0x1] %vm332_vm4, %v331_v32 }
 0x12d PF: > { %s16_s16 = sadd.s32 1, %s573_s16   ;;  %s706_s12 = smov %s561_s13 }
 0x12e   : > { %p13_p10 = scmp.ge.s32.totalorder %s16_s16, 4   ;;  %s684_s13 = smov 0  }
 0x12f   : > { %s707_s14 = smov %s569_s15  ;;  %s708_s15 = smov %s710_s18 }
 0x130   :  { %15 = sbr.rel (!%p13_p10) target bundleno = 4 (0x4), region = 86 }
 0x137   :  { %351 = vsyncpa [#allocation4], 1 }
 0x138   :  { %353 = vsyncpa [#allocation4 + $0x1], 1 }

</bundles_post_ra>
